<compile_context>
chip_gen: v5e
topology: v5e:2x2
jax: 0.10.0
libtpu: 0.0.40
codegen_flags: <defaults>
</compile_context>

<pallas_src>
import functools

import jax
import jax.numpy as jnp
from jax.experimental import pallas as pl
from jax.experimental.pallas import tpu as pltpu


INPUT_SIZE = 16
HIDDEN_SIZE = 32
NUM_LAYERS = 3
BATCH = 8
LANES = 128            # lane-dense output width (multiple of 128)
ROLLOUT_STEPS = 12


# ----------------------------------------------------------------------------- kernels
def _lstm_stack(layer_in, h_src_ref, c_src_ref, w_ref, b_ref, *, hidden, num_layers):
    """Run the stacked LSTM for one timestep.

    layer_in : (B, H)   -- layer-0 input already zero-padded to width H
    h_src_ref, c_src_ref : (L, B, H) refs holding the previous state
    w_ref : (L, 2H, 4H) fused [W_ih_t ; W_hh_t], b_ref : (L, 1, 4H) combined bias
    Returns (top_hidden (B,H), hn (L,B,H), cn (L,B,H)).
    """
    batch = layer_in.shape[0]
    # Static lane mask selecting the g-gate region [2H, 3H) -- hoisted out of the loop.
    lane = jax.lax.broadcasted_iota(jnp.int32, (batch, 4 * hidden), 1)
    g_mask = jnp.logical_and(lane >= 2 * hidden, lane < 3 * hidden)

    h_news, c_news = [], []
    for l in range(num_layers):                       # static unroll (L = 3)
        h_prev = h_src_ref[l]                         # (B, H)
        c_prev = c_src_ref[l]                         # (B, H)
        cat = jnp.concatenate([layer_in, h_prev], axis=-1)          # (B, 2H)
        gates = (
            jnp.dot(cat, w_ref[l], preferred_element_type=jnp.float32)
            + b_ref[l]
        )                                                           # (B, 4H) = (B, 128)
        # Full-vreg nonlinearities; PyTorch gate order i, f, g, o.
        act = jnp.where(g_mask, jnp.tanh(gates), jax.nn.sigmoid(gates))
        i_g = act[:, 0 * hidden:1 * hidden]
        f_g = act[:, 1 * hidden:2 * hidden]
        g_g = act[:, 2 * hidden:3 * hidden]
        o_g = act[:, 3 * hidden:4 * hidden]
        c_new = f_g * c_prev + i_g * g_g
        h_new = o_g * jnp.tanh(c_new)
        h_news.append(h_new)
        c_news.append(c_new)
        layer_in = h_new                               # feed next stacked layer
    return layer_in, jnp.stack(h_news), jnp.stack(c_news)


def _decoder_step_kernel(
    x_ref, h0_ref, c0_ref, w_ref, b_ref, wlin_ref, blin_ref,      # inputs
    out_ref, hn_ref, cn_ref,                                      # outputs
    *, hidden, num_layers,
):
    top, hn, cn = _lstm_stack(
        x_ref[...], h0_ref, c0_ref, w_ref, b_ref,
        hidden=hidden, num_layers=num_layers,
    )
    hn_ref[...] = hn
    cn_ref[...] = cn
    # Lane-dense (B, 128) output; real columns [0, input_size), rest are exact zeros.
    out_ref[...] = (
        jnp.dot(top, wlin_ref[...], preferred_element_type=jnp.float32) + blin_ref[...]
    )


def _decoder_rollout_kernel(
    x0_ref, h0_ref, c0_ref, w_ref, b_ref, wlin_ref, blin_ref,     # inputs
    out_ref, hn_ref, cn_ref,                                      # outputs
    xbuf,                                                         # VMEM scratch (B, H)
    *, hidden, num_layers,
):
    """Autoregressive decode: grid axis 0 is the timestep. Weights/bias/state blocks have
    constant index maps, so they are DMA'd once and stay resident in VMEM; the fed-back
    input is carried in `xbuf` across grid iterations."""
    @pl.when(pl.program_id(0) == 0)
    def _init():
        xbuf[...] = x0_ref[...]
        hn_ref[...] = h0_ref[...]
        cn_ref[...] = c0_ref[...]

    top, hn, cn = _lstm_stack(
        xbuf[...], hn_ref, cn_ref, w_ref, b_ref,
        hidden=hidden, num_layers=num_layers,
    )
    hn_ref[...] = hn
    cn_ref[...] = cn

    out = jnp.dot(top, wlin_ref[...], preferred_element_type=jnp.float32) + blin_ref[...]
    out_ref[0] = out                      # (B, 128) lane-dense slab for this step
    # Feed the prediction back as the next step's (already zero-padded) layer-0 input.
    xbuf[...] = out[:, :hidden]


# ----------------------------------------------------------------------------- wrappers
def _pad_input(x, hidden):
    b, in_feat = x.shape
    assert in_feat <= hidden, "kernel assumes input_size <= hidden_size"
    if in_feat < hidden:
        x = jnp.pad(x, ((0, 0), (0, hidden - in_feat)))
    return x


def lstm_decoder_forward(x, h0, c0, params):
    """Single decode step, faithful to the PyTorch module forward."""
    B, input_size = x.shape
    L, _, H = h0.shape
    x_pad = _pad_input(x, H)

    kernel = functools.partial(_decoder_step_kernel, hidden=H, num_layers=L)
    vmem = pl.BlockSpec(memory_space=pltpu.MemorySpace.VMEM)

    out_pad, hn, cn = pl.pallas_call(
        kernel,
        out_shape=(
            jax.ShapeDtypeStruct((B, LANES), jnp.float32),    # lane-dense output
            jax.ShapeDtypeStruct((L, B, H), jnp.float32),     # hn  (aliases h0)
            jax.ShapeDtypeStruct((L, B, H), jnp.float32),     # cn  (aliases c0)
        ),
        in_specs=[vmem] * 7,
        out_specs=(vmem, vmem, vmem),
        input_output_aliases={1: 1, 2: 2},                    # h0->hn, c0->cn in place
    )(
        x_pad, h0, c0,
        params["w_fused"], params["b_fused"],
        params["w_lin_pad"], params["b_lin_pad"],
    )
    return out_pad[:, :input_size], hn, cn


def lstm_decoder_rollout(x0, h0, c0, params, num_steps):
    """num_steps autoregressive decode steps fused into ONE pallas_call (grid over time).
    Weights are DMA'd into VMEM once and reused across every step."""
    B, input_size = x0.shape
    L, _, H = h0.shape
    x_pad = _pad_input(x0, H)

    kernel = functools.partial(_decoder_rollout_kernel, hidden=H, num_layers=L)

    outs_pad, hn, cn = pl.pallas_call(
        kernel,
        out_shape=(
            jax.ShapeDtypeStruct((num_steps, B, LANES), jnp.float32),
            jax.ShapeDtypeStruct((L, B, H), jnp.float32),
            jax.ShapeDtypeStruct((L, B, H), jnp.float32),
        ),
        grid=(num_steps,),
        in_specs=[
            pl.BlockSpec((B, H), lambda t: (0, 0)),                 # x0 (step 0 only)
            pl.BlockSpec((L, B, H), lambda t: (0, 0, 0)),           # h0
            pl.BlockSpec((L, B, H), lambda t: (0, 0, 0)),           # c0
            pl.BlockSpec((L, 2 * H, 4 * H), lambda t: (0, 0, 0)),   # fused weights
            pl.BlockSpec((L, 1, 4 * H), lambda t: (0, 0, 0)),       # fused biases
            pl.BlockSpec((H, LANES), lambda t: (0, 0)),             # linear weight (padded)
            pl.BlockSpec((1, LANES), lambda t: (0, 0)),             # linear bias (padded)
        ],
        out_specs=(
            pl.BlockSpec((1, B, LANES), lambda t: (t, 0, 0)),       # per-step output
            pl.BlockSpec((L, B, H), lambda t: (0, 0, 0)),           # resident hn
            pl.BlockSpec((L, B, H), lambda t: (0, 0, 0)),           # resident cn
        ),
        scratch_shapes=[pltpu.VMEM((B, H), jnp.float32)],           # fed-back input
        input_output_aliases={1: 1, 2: 2},
        compiler_params=pltpu.CompilerParams(dimension_semantics=("arbitrary",)),
    )(
        x_pad, h0, c0,
        params["w_fused"], params["b_fused"],
        params["w_lin_pad"], params["b_lin_pad"],
    )
    return outs_pad[:, :, :input_size], hn, cn


# ----------------------------------------------------------------------------- params
def init_params(key, input_size, hidden_size, num_layers):
    """PyTorch-style U(-1/sqrt(H), 1/sqrt(H)) init. Returns both raw (PyTorch layout)
    weights for the reference and packed/padded tensors for the kernel."""
    bound = 1.0 / (hidden_size ** 0.5)
    keys = jax.random.split(key, num_layers * 4 + 2)

    w_ih, w_hh, b_ih, b_hh = [], [], [], []
    ki = 0
    for l in range(num_layers):
        in_feat = input_size if l == 0 else hidden_size
        w_ih.append(jax.random.uniform(keys[ki], (4 * hidden_size, in_feat),
                                       jnp.float32, minval=-bound, maxval=bound)); ki += 1
        w_hh.append(jax.random.uniform(keys[ki], (4 * hidden_size, hidden_size),
                                       jnp.float32, minval=-bound, maxval=bound)); ki += 1
        b_ih.append(jax.random.uniform(keys[ki], (4 * hidden_size,),
                                       jnp.float32, minval=-bound, maxval=bound)); ki += 1
        b_hh.append(jax.random.uniform(keys[ki], (4 * hidden_size,),
                                       jnp.float32, minval=-bound, maxval=bound)); ki += 1
    w_lin = jax.random.uniform(keys[ki], (input_size, hidden_size),
                               jnp.float32, minval=-bound, maxval=bound); ki += 1
    b_lin = jax.random.uniform(keys[ki], (input_size,),
                               jnp.float32, minval=-bound, maxval=bound)

    # --- pack for the kernel ---
    w_fused, b_fused = [], []
    for l in range(num_layers):
        w_ih_t = w_ih[l].T                                     # (in_feat, 4H)
        pad = hidden_size - w_ih_t.shape[0]
        if pad > 0:                                            # layer 0: pad rows with 0
            w_ih_t = jnp.pad(w_ih_t, ((0, pad), (0, 0)))
        w_fused.append(jnp.concatenate([w_ih_t, w_hh[l].T], axis=0))   # (2H, 4H)
        b_fused.append((b_ih[l] + b_hh[l]).reshape(1, 4 * hidden_size))
    w_fused = jnp.stack(w_fused)                               # (L, 2H, 4H)
    b_fused = jnp.stack(b_fused)                               # (L, 1, 4H)
    w_lin_pad = jnp.pad(w_lin.T, ((0, 0), (0, LANES - input_size)))    # (H, 128)
    b_lin_pad = jnp.pad(b_lin, (0, LANES - input_size)).reshape(1, LANES)

    return dict(
        w_ih=w_ih, w_hh=w_hh, b_ih=b_ih, b_hh=b_hh, w_lin=w_lin, b_lin=b_lin,
        w_fused=w_fused, b_fused=b_fused, w_lin_pad=w_lin_pad, b_lin_pad=b_lin_pad,
    )


# ----------------------------------------------------------------------------- reference
def _reference_step(x, h0, c0, params):
    """Pure-JAX reference using the raw PyTorch-layout weights (i, f, g, o gate order)."""
    H = h0.shape[-1]
    hp = jax.lax.Precision.HIGHEST
    layer_in = x
    hs, cs = [], []
    for l in range(h0.shape[0]):
        gates = (
            jnp.dot(layer_in, params["w_ih"][l].T, precision=hp)
            + jnp.dot(h0[l], params["w_hh"][l].T, precision=hp)
            + params["b_ih"][l] + params["b_hh"][l]
        )
        i = jax.nn.sigmoid(gates[:, 0 * H:1 * H])
        f = jax.nn.sigmoid(gates[:, 1 * H:2 * H])
        g = jnp.tanh(gates[:, 2 * H:3 * H])
        o = jax.nn.sigmoid(gates[:, 3 * H:4 * H])
        c_new = f * c0[l] + i * g
        h_new = o * jnp.tanh(c_new)
        hs.append(h_new)
        cs.append(c_new)
        layer_in = h_new
    out = jnp.dot(layer_in, params["w_lin"].T, precision=hp) + params["b_lin"]
    return out, jnp.stack(hs), jnp.stack(cs)


def _reference_rollout(x0, h0, c0, params, num_steps):
    outs = []
    x, h, c = x0, h0, c0
    for _ in range(num_steps):
        out, h, c = _reference_step(x, h, c, params)
        outs.append(out)
        x = out
    return jnp.stack(outs), h, c


# ----------------------------------------------------------------------------- main
if __name__ == "__main__":
    key = jax.random.PRNGKey(0)
    k_x, k_h, k_c, k_p = jax.random.split(key, 4)

    x = jax.random.normal(k_x, (BATCH, INPUT_SIZE), dtype=jnp.float32)
    h0 = jax.random.normal(k_h, (NUM_LAYERS, BATCH, HIDDEN_SIZE), dtype=jnp.float32)
    c0 = jax.random.normal(k_c, (NUM_LAYERS, BATCH, HIDDEN_SIZE), dtype=jnp.float32)
    params = init_params(k_p, INPUT_SIZE, HIDDEN_SIZE, NUM_LAYERS)

    # 1) Single-step forward (exact PyTorch module semantics).
    out, hn, cn = lstm_decoder_forward(x, h0, c0, params)
    jax.block_until_ready((out, hn, cn))
    ref_out, ref_hn, ref_cn = _reference_step(x, h0, c0, params)
    assert jnp.allclose(out, ref_out, rtol=1e-4, atol=1e-4)
    assert jnp.allclose(hn, ref_hn, rtol=1e-4, atol=1e-4)
    assert jnp.allclose(cn, ref_cn, rtol=1e-4, atol=1e-4)

    # 2) Multi-step autoregressive decode fused into one kernel (weights resident in VMEM).
    outs, hn_r, cn_r = lstm_decoder_rollout(x, h0, c0, params, ROLLOUT_STEPS)
    jax.block_until_ready((outs, hn_r, cn_r))
    ref_outs, ref_hn_r, ref_cn_r = _reference_rollout(x, h0, c0, params, ROLLOUT_STEPS)
    assert jnp.allclose(outs, ref_outs, rtol=1e-3, atol=1e-3)
    assert jnp.allclose(hn_r, ref_hn_r, rtol=1e-3, atol=1e-3)
    assert jnp.allclose(cn_r, ref_cn_r, rtol=1e-3, atol=1e-3)

    print("KERNEL_OK")
</pallas_src>

<mosaic_0001>
module attributes {stable_mosaic.version = 11 : i64} {
  func.func @_decoder_step_kernel(%arg0: memref<8x32xf32, #tpu.memory_space<vmem>>, %arg1: memref<3x8x32xf32, #tpu.memory_space<vmem>>, %arg2: memref<3x8x32xf32, #tpu.memory_space<vmem>>, %arg3: memref<3x64x128xf32, #tpu.memory_space<vmem>>, %arg4: memref<3x1x128xf32, #tpu.memory_space<vmem>>, %arg5: memref<32x128xf32, #tpu.memory_space<vmem>>, %arg6: memref<1x128xf32, #tpu.memory_space<vmem>>, %arg7: memref<8x128xf32, #tpu.memory_space<vmem>>, %arg8: memref<3x8x32xf32, #tpu.memory_space<vmem>>, %arg9: memref<3x8x32xf32, #tpu.memory_space<vmem>>) attributes {dimension_semantics = [], scalar_prefetch = 0 : i64, scratch_operands = 0 : i64, tpu.core_type = #tpu.core_type<tc>} {
    %c0 = arith.constant 0 : index
    %c0_0 = arith.constant 0 : index
    %0 = vector.load %arg0[%c0, %c0_0] : memref<8x32xf32, #tpu.memory_space<vmem>>, vector<8x32xf32>
    %1 = tpu.iota {dimensions = array<i32: 1>} : vector<8x128xi32>
    %c64_i32 = arith.constant 64 : i32
    %2 = vector.broadcast %c64_i32 : i32 to vector<8x128xi32>
    %3 = arith.cmpi sge, %1, %2 : vector<8x128xi32>
    %c96_i32 = arith.constant 96 : i32
    %4 = vector.broadcast %c96_i32 : i32 to vector<8x128xi32>
    %5 = arith.cmpi slt, %1, %4 : vector<8x128xi32>
    %6 = arith.andi %3, %5 : vector<8x128xi1>
    %c0_1 = arith.constant 0 : index
    %c0_2 = arith.constant 0 : index
    %c0_3 = arith.constant 0 : index
    %7 = vector.load %arg1[%c0_1, %c0_2, %c0_3] : memref<3x8x32xf32, #tpu.memory_space<vmem>>, vector<1x8x32xf32>
    %8 = vector.shape_cast %7 : vector<1x8x32xf32> to vector<8x32xf32>
    %c0_4 = arith.constant 0 : index
    %c0_5 = arith.constant 0 : index
    %c0_6 = arith.constant 0 : index
    %9 = vector.load %arg2[%c0_4, %c0_5, %c0_6] : memref<3x8x32xf32, #tpu.memory_space<vmem>>, vector<1x8x32xf32>
    %10 = vector.shape_cast %9 : vector<1x8x32xf32> to vector<8x32xf32>
    %11 = tpu.concatenate %0, %8 in 1 : vector<8x32xf32>, vector<8x32xf32> -> vector<8x64xf32>
    %c0_7 = arith.constant 0 : index
    %c0_8 = arith.constant 0 : index
    %c0_9 = arith.constant 0 : index
    %12 = vector.load %arg3[%c0_7, %c0_8, %c0_9] : memref<3x64x128xf32, #tpu.memory_space<vmem>>, vector<1x64x128xf32>
    %13 = vector.shape_cast %12 : vector<1x64x128xf32> to vector<64x128xf32>
    %cst = arith.constant dense<0.000000e+00> : vector<8x128xf32>
    %14 = tpu.matmul %11, %13, %cst {dimension_numbers = #tpu.dot_dimension_numbers<[1], [0], [0], [1], [0, 0, 1, 1], [], []>} : vector<8x64xf32>, vector<64x128xf32>, vector<8x128xf32> -> vector<8x128xf32>
    %c0_10 = arith.constant 0 : index
    %c0_11 = arith.constant 0 : index
    %c0_12 = arith.constant 0 : index
    %15 = vector.load %arg4[%c0_10, %c0_11, %c0_12] : memref<3x1x128xf32, #tpu.memory_space<vmem>>, vector<1x1x128xf32>
    %16 = vector.shape_cast %15 : vector<1x1x128xf32> to vector<1x128xf32>
    %17 = vector.broadcast %16 : vector<1x128xf32> to vector<8x128xf32>
    %18 = arith.addf %14, %17 : vector<8x128xf32>
    %19 = math.tanh %18 : vector<8x128xf32>
    %20 = arith.negf %18 : vector<8x128xf32>
    %21 = math.exp %20 : vector<8x128xf32>
    %cst_13 = arith.constant 1.000000e+00 : f32
    %22 = vector.broadcast %cst_13 : f32 to vector<8x128xf32>
    %23 = arith.addf %22, %21 : vector<8x128xf32>
    %24 = arith.divf %22, %23 : vector<8x128xf32>
    %25 = arith.select %6, %19, %24 : vector<8x128xi1>, vector<8x128xf32>
    %26 = vector.extract_strided_slice %25 {offsets = [0, 0], sizes = [8, 32], strides = [1, 1]} : vector<8x128xf32> to vector<8x32xf32>
    %27 = vector.extract_strided_slice %25 {offsets = [0, 32], sizes = [8, 32], strides = [1, 1]} : vector<8x128xf32> to vector<8x32xf32>
    %28 = vector.extract_strided_slice %25 {offsets = [0, 64], sizes = [8, 32], strides = [1, 1]} : vector<8x128xf32> to vector<8x32xf32>
    %29 = vector.extract_strided_slice %25 {offsets = [0, 96], sizes = [8, 32], strides = [1, 1]} : vector<8x128xf32> to vector<8x32xf32>
    %30 = arith.mulf %27, %10 : vector<8x32xf32>
    %31 = arith.mulf %26, %28 : vector<8x32xf32>
    %32 = arith.addf %30, %31 : vector<8x32xf32>
    %33 = math.tanh %32 : vector<8x32xf32>
    %34 = arith.mulf %29, %33 : vector<8x32xf32>
    %c1 = arith.constant 1 : index
    %c0_14 = arith.constant 0 : index
    %c0_15 = arith.constant 0 : index
    %35 = vector.load %arg1[%c1, %c0_14, %c0_15] : memref<3x8x32xf32, #tpu.memory_space<vmem>>, vector<1x8x32xf32>
    %36 = vector.shape_cast %35 : vector<1x8x32xf32> to vector<8x32xf32>
    %c1_16 = arith.constant 1 : index
    %c0_17 = arith.constant 0 : index
    %c0_18 = arith.constant 0 : index
    %37 = vector.load %arg2[%c1_16, %c0_17, %c0_18] : memref<3x8x32xf32, #tpu.memory_space<vmem>>, vector<1x8x32xf32>
    %38 = vector.shape_cast %37 : vector<1x8x32xf32> to vector<8x32xf32>
    %39 = tpu.concatenate %34, %36 in 1 : vector<8x32xf32>, vector<8x32xf32> -> vector<8x64xf32>
    %c1_19 = arith.constant 1 : index
    %c0_20 = arith.constant 0 : index
    %c0_21 = arith.constant 0 : index
    %40 = vector.load %arg3[%c1_19, %c0_20, %c0_21] : memref<3x64x128xf32, #tpu.memory_space<vmem>>, vector<1x64x128xf32>
    %41 = vector.shape_cast %40 : vector<1x64x128xf32> to vector<64x128xf32>
    %cst_22 = arith.constant dense<0.000000e+00> : vector<8x128xf32>
    %42 = tpu.matmul %39, %41, %cst_22 {dimension_numbers = #tpu.dot_dimension_numbers<[1], [0], [0], [1], [0, 0, 1, 1], [], []>} : vector<8x64xf32>, vector<64x128xf32>, vector<8x128xf32> -> vector<8x128xf32>
    %c1_23 = arith.constant 1 : index
    %c0_24 = arith.constant 0 : index
    %c0_25 = arith.constant 0 : index
    %43 = vector.load %arg4[%c1_23, %c0_24, %c0_25] : memref<3x1x128xf32, #tpu.memory_space<vmem>>, vector<1x1x128xf32>
    %44 = vector.shape_cast %43 : vector<1x1x128xf32> to vector<1x128xf32>
    %45 = vector.broadcast %44 : vector<1x128xf32> to vector<8x128xf32>
    %46 = arith.addf %42, %45 : vector<8x128xf32>
    %47 = math.tanh %46 : vector<8x128xf32>
    %48 = arith.negf %46 : vector<8x128xf32>
    %49 = math.exp %48 : vector<8x128xf32>
    %cst_26 = arith.constant 1.000000e+00 : f32
    %50 = vector.broadcast %cst_26 : f32 to vector<8x128xf32>
    %51 = arith.addf %50, %49 : vector<8x128xf32>
    %52 = arith.divf %50, %51 : vector<8x128xf32>
    %53 = arith.select %6, %47, %52 : vector<8x128xi1>, vector<8x128xf32>
    %54 = vector.extract_strided_slice %53 {offsets = [0, 0], sizes = [8, 32], strides = [1, 1]} : vector<8x128xf32> to vector<8x32xf32>
    %55 = vector.extract_strided_slice %53 {offsets = [0, 32], sizes = [8, 32], strides = [1, 1]} : vector<8x128xf32> to vector<8x32xf32>
    %56 = vector.extract_strided_slice %53 {offsets = [0, 64], sizes = [8, 32], strides = [1, 1]} : vector<8x128xf32> to vector<8x32xf32>
    %57 = vector.extract_strided_slice %53 {offsets = [0, 96], sizes = [8, 32], strides = [1, 1]} : vector<8x128xf32> to vector<8x32xf32>
    %58 = arith.mulf %55, %38 : vector<8x32xf32>
    %59 = arith.mulf %54, %56 : vector<8x32xf32>
    %60 = arith.addf %58, %59 : vector<8x32xf32>
    %61 = math.tanh %60 : vector<8x32xf32>
    %62 = arith.mulf %57, %61 : vector<8x32xf32>
    %c2 = arith.constant 2 : index
    %c0_27 = arith.constant 0 : index
    %c0_28 = arith.constant 0 : index
    %63 = vector.load %arg1[%c2, %c0_27, %c0_28] : memref<3x8x32xf32, #tpu.memory_space<vmem>>, vector<1x8x32xf32>
    %64 = vector.shape_cast %63 : vector<1x8x32xf32> to vector<8x32xf32>
    %c2_29 = arith.constant 2 : index
    %c0_30 = arith.constant 0 : index
    %c0_31 = arith.constant 0 : index
    %65 = vector.load %arg2[%c2_29, %c0_30, %c0_31] : memref<3x8x32xf32, #tpu.memory_space<vmem>>, vector<1x8x32xf32>
    %66 = vector.shape_cast %65 : vector<1x8x32xf32> to vector<8x32xf32>
    %67 = tpu.concatenate %62, %64 in 1 : vector<8x32xf32>, vector<8x32xf32> -> vector<8x64xf32>
    %c2_32 = arith.constant 2 : index
    %c0_33 = arith.constant 0 : index
    %c0_34 = arith.constant 0 : index
    %68 = vector.load %arg3[%c2_32, %c0_33, %c0_34] : memref<3x64x128xf32, #tpu.memory_space<vmem>>, vector<1x64x128xf32>
    %69 = vector.shape_cast %68 : vector<1x64x128xf32> to vector<64x128xf32>
    %cst_35 = arith.constant dense<0.000000e+00> : vector<8x128xf32>
    %70 = tpu.matmul %67, %69, %cst_35 {dimension_numbers = #tpu.dot_dimension_numbers<[1], [0], [0], [1], [0, 0, 1, 1], [], []>} : vector<8x64xf32>, vector<64x128xf32>, vector<8x128xf32> -> vector<8x128xf32>
    %c2_36 = arith.constant 2 : index
    %c0_37 = arith.constant 0 : index
    %c0_38 = arith.constant 0 : index
    %71 = vector.load %arg4[%c2_36, %c0_37, %c0_38] : memref<3x1x128xf32, #tpu.memory_space<vmem>>, vector<1x1x128xf32>
    %72 = vector.shape_cast %71 : vector<1x1x128xf32> to vector<1x128xf32>
    %73 = vector.broadcast %72 : vector<1x128xf32> to vector<8x128xf32>
    %74 = arith.addf %70, %73 : vector<8x128xf32>
    %75 = math.tanh %74 : vector<8x128xf32>
    %76 = arith.negf %74 : vector<8x128xf32>
    %77 = math.exp %76 : vector<8x128xf32>
    %cst_39 = arith.constant 1.000000e+00 : f32
    %78 = vector.broadcast %cst_39 : f32 to vector<8x128xf32>
    %79 = arith.addf %78, %77 : vector<8x128xf32>
    %80 = arith.divf %78, %79 : vector<8x128xf32>
    %81 = arith.select %6, %75, %80 : vector<8x128xi1>, vector<8x128xf32>
    %82 = vector.extract_strided_slice %81 {offsets = [0, 0], sizes = [8, 32], strides = [1, 1]} : vector<8x128xf32> to vector<8x32xf32>
    %83 = vector.extract_strided_slice %81 {offsets = [0, 32], sizes = [8, 32], strides = [1, 1]} : vector<8x128xf32> to vector<8x32xf32>
    %84 = vector.extract_strided_slice %81 {offsets = [0, 64], sizes = [8, 32], strides = [1, 1]} : vector<8x128xf32> to vector<8x32xf32>
    %85 = vector.extract_strided_slice %81 {offsets = [0, 96], sizes = [8, 32], strides = [1, 1]} : vector<8x128xf32> to vector<8x32xf32>
    %86 = arith.mulf %83, %66 : vector<8x32xf32>
    %87 = arith.mulf %82, %84 : vector<8x32xf32>
    %88 = arith.addf %86, %87 : vector<8x32xf32>
    %89 = math.tanh %88 : vector<8x32xf32>
    %90 = arith.mulf %85, %89 : vector<8x32xf32>
    %91 = vector.shape_cast %34 : vector<8x32xf32> to vector<1x8x32xf32>
    %92 = vector.shape_cast %62 : vector<8x32xf32> to vector<1x8x32xf32>
    %93 = vector.shape_cast %90 : vector<8x32xf32> to vector<1x8x32xf32>
    %94 = tpu.concatenate %91, %92, %93 in 0 : vector<1x8x32xf32>, vector<1x8x32xf32>, vector<1x8x32xf32> -> vector<3x8x32xf32>
    %95 = vector.shape_cast %32 : vector<8x32xf32> to vector<1x8x32xf32>
    %96 = vector.shape_cast %60 : vector<8x32xf32> to vector<1x8x32xf32>
    %97 = vector.shape_cast %88 : vector<8x32xf32> to vector<1x8x32xf32>
    %98 = tpu.concatenate %95, %96, %97 in 0 : vector<1x8x32xf32>, vector<1x8x32xf32>, vector<1x8x32xf32> -> vector<3x8x32xf32>
    %c0_40 = arith.constant 0 : index
    %c0_41 = arith.constant 0 : index
    %c0_42 = arith.constant 0 : index
    %99 = vector.load %arg8[%c0_40, %c0_41, %c0_42] : memref<3x8x32xf32, #tpu.memory_space<vmem>>, vector<3x8x32xf32>
    tpu.vector_store %arg8[%c0_40, %c0_41, %c0_42], %94 {strides = array<i32>} : memref<3x8x32xf32, #tpu.memory_space<vmem>>, vector<3x8x32xf32>,
    %c0_43 = arith.constant 0 : index
    %c0_44 = arith.constant 0 : index
    %c0_45 = arith.constant 0 : index
    %100 = vector.load %arg9[%c0_43, %c0_44, %c0_45] : memref<3x8x32xf32, #tpu.memory_space<vmem>>, vector<3x8x32xf32>
    tpu.vector_store %arg9[%c0_43, %c0_44, %c0_45], %98 {strides = array<i32>} : memref<3x8x32xf32, #tpu.memory_space<vmem>>, vector<3x8x32xf32>,
    %c0_46 = arith.constant 0 : index
    %c0_47 = arith.constant 0 : index
    %101 = vector.load %arg5[%c0_46, %c0_47] : memref<32x128xf32, #tpu.memory_space<vmem>>, vector<32x128xf32>
    %cst_48 = arith.constant dense<0.000000e+00> : vector<8x128xf32>
    %102 = tpu.matmul %90, %101, %cst_48 {dimension_numbers = #tpu.dot_dimension_numbers<[1], [0], [0], [1], [0, 0, 1, 1], [], []>} : vector<8x32xf32>, vector<32x128xf32>, vector<8x128xf32> -> vector<8x128xf32>
    %c0_49 = arith.constant 0 : index
    %c0_50 = arith.constant 0 : index
    %103 = vector.load %arg6[%c0_49, %c0_50] : memref<1x128xf32, #tpu.memory_space<vmem>>, vector<1x128xf32>
    %104 = vector.broadcast %103 : vector<1x128xf32> to vector<8x128xf32>
    %105 = arith.addf %102, %104 : vector<8x128xf32>
    %c0_51 = arith.constant 0 : index
    %c0_52 = arith.constant 0 : index
    %106 = vector.load %arg7[%c0_51, %c0_52] : memref<8x128xf32, #tpu.memory_space<vmem>>, vector<8x128xf32>
    tpu.vector_store %arg7[%c0_51, %c0_52], %105 {strides = array<i32>} : memref<8x128xf32, #tpu.memory_space<vmem>>, vector<8x128xf32>,
    return
  }
}

</mosaic_0001>

<bundles_post_ra>
// kernel: tpu_custom_call.1
= control target key start
LH: loop header
LB: loop body
LE: loop exit
PB: predicated region body
PF: predicated region fallthrough
CT: control target
= control target key end

     0   :  { %15 = vsyncpa [#allocation3], 0  ;;  %s830_s0 = inlined_call_operand.vmem [shape: f32[8,32], index: 0, kind: input, shape index: {}]   ;;  %s831_s1 = inlined_call_operand.hbm [shape: f32[3,8,32], index: 1, kind: input, shape index: {}, may-alias: {1,8}]   ;;  %s832_s2 = inlined_call_operand.hbm [shape: f32[3,8,32], index: 2, kind: input, shape index: {}, may-alias: {2,9}]   ;;  %s833_s3 = inlined_call_operand.hbm [shape: f32[3,64,128], index: 3, kind: input, shape index: {}]   ;;  %s834_s4 = inlined_call_operand.vmem [shape: f32[3,1,128], index: 4, kind: input, shape index: {}]   ;;  %s835_s5 = inlined_call_operand.vmem [shape: f32[32,128], index: 5, kind: input, shape index: {}]   ;;  %s836_s6 = inlined_call_operand.vmem [shape: f32[1,128], index: 6, kind: input, shape index: {}]   ;;  %s837_s7 = inlined_call_operand.hbm [shape: f32[8,128], index: 7, kind: output, shape index: {0}]   ;;  %s838_s8 = inlined_call_operand.hbm [shape: f32[3,8,32], index: 8, kind: output, shape index: {1}, may-alias: {1,8}]   ;;  %s839_s9 = inlined_call_operand.hbm [shape: f32[3,8,32], index: 9, kind: output, shape index: {2}, may-alias: {2,9}]  }
   0x1   :  { %16 = vsyncpa [#allocation6], 0 }
   0x2   :  { %17 = vsyncpa [#allocation4], 0 }
   0x3   :  { %18 = vsyncpa [#allocation10], 0  ;;  %s38_s11 = sshll.u32 %s832_s2, 4  ;;  %s660_s12 = smov [#allocation5]   ;;  %s39_s11 = int_to_ptr.hbm [resolvable:$true] %s38_s11 }
   0x4   :  { %s40_s13 = sshll.u32 %s660_s12, 4  ;;  %s25_s16 = sshll.u32 %s831_s1, 4  ;;  %s41_s13 = int_to_ptr.vmem [resolvable:$true] %s40_s13  ;;  %s26_s16 = int_to_ptr.hbm [resolvable:$true] %s25_s16 }
   0x5   :  { %s661_s17 = smov 128   ;;  %s662_s18 = smov 8  }
   0x6   :  { %46 = dma.hbm_to_vmem [thread:$0]  %s39_s11, 384, %s41_s13, [#allocation6], %s661_s17, %s661_s17, %s662_s18  }
   0x7   :  { %s663_s19 = smov [#allocation2]   ;;  %s51_s2 = sshll.u32 %s833_s3, 4  ;;  %s52_s2 = int_to_ptr.hbm [resolvable:$true] %s51_s2 }
   0x8   :  { %s27_s20 = sshll.u32 %s663_s19, 4  ;;  %s664_s1 = smov [#allocation7]   ;;  %s28_s20 = int_to_ptr.vmem [resolvable:$true] %s27_s20 }
   0x9   :  { %33 = dma.hbm_to_vmem [thread:$0]  %s26_s16, 384, %s28_s20, [#allocation3], %s661_s17, %s661_s17, %s662_s18  }
   0xa   :  { %s53_s23 = sshll.u32 %s664_s1, 4  ;;  %s54_s23 = int_to_ptr.vmem [resolvable:$true] %s53_s23 }
   0xb   :  { %59 = dma.hbm_to_vmem [thread:$0]  %s52_s2, 3072, %s54_s23, [#allocation6], %s661_s17, %s661_s17, %s662_s18  }
   0xc   :  { %652 = dma.done.wait [#allocation3], 384  }
   0xd   :  { %653 = vsyncadd [#allocation3], 4294966912 }
   0xe   :  { %654 = dma.done.wait [#allocation6], 3456  }
   0xf   :  { %655 = vsyncadd [#allocation6], 4294963840  ;;  %v84_v0 = vld [vmem:[#allocation2] sm:$0xff]  ;;  %v99_v1 = vld [vmem:[#allocation7 + $0x38] sm:$0xff]  ;;  %s665_s3 = smov 32   ;;  %vm90_vm0 = vcmask 261120   ;;  %v79_v19 = vlaneseq }
  0x10   :  { %v98_v2 = vld [vmem:[#allocation7 + $0x30] sm:$0xff]  ;;  %87 = vrot.lane.b32.xlu0 %v84_v0, %s665_s3  ;;  %116 = vmatpush.msra.mxu0 %v99_v1  ;;  %v97_v3 = vld [vmem:[#allocation7 + $0x28] sm:$0xff]  ;;  %v96_v4 = vld [vmem:[#allocation7 + $0x20] sm:$0xff]  ;;  %vm104_vm1 = vcmask 523264   ;;  %s668_s21 = smov [#allocation9]   ;;  %s669_s23 = smov [#allocation11]  }
  0x11   :  { %v95_v5 = vld [vmem:[#allocation7 + $0x18] sm:$0xff]  ;;  %v94_v6 = vld [vmem:[#allocation7 + $0x10] sm:$0xff]  ;;  %v93_v7 = vld [vmem:[#allocation7 + $0x8] sm:$0xff]  ;;  %v80_v21 = vand.u32 127, %v79_v19  ;;  %s422_s22 = sshll.u32 %s668_s21, 4  ;;  %s437_s26 = sshll.u32 %s839_s9, 4  ;;  %s423_s22 = int_to_ptr.vmem [resolvable:$true] %s422_s22  ;;  %s438_s26 = int_to_ptr.hbm [resolvable:$true] %s437_s26 }
  0x12   :  { %117 = vmatpush.msra.mxu0 %v98_v2  ;;  %v92_v8 = vld [vmem:[#allocation7] sm:$0xff]  ;;  %v85_v9 = vld [vmem:[#allocation5] sm:$0xff]  ;;  %v78_v10 = vld [vmem:[%s830_s0] sm:$0xff]  ;;  %s666_s0 = smov 64   ;;  %s414_s10 = sshll.u32 %s837_s7, 4  ;;  %s415_s10 = int_to_ptr.hbm [resolvable:$true] %s414_s10 }
  0x13   :  { %150 = vrot.lane.b32.xlu1 %v85_v9, %s665_s3  ;;  %v480_v13 = vld [vmem:[%s834_s4] ss:$0 sm:$0xff]  ;;  %vm81_vm2 = vcmp.ge.s32.totalorder %v80_v21, 64  ;;  %vm82_vm3 = vcmp.lt.s32.totalorder %v80_v21, 96  ;;  %v171_v36 = vld [vmem:[#allocation2 + $0x8] sm:$0xff]  ;;  %v189_v44 = vld [vmem:[#allocation7 + $0x68] sm:$0xff] }
  0x14   :  { %118 = vmatpush.msra.mxu0 %v97_v3  ;;  %vm749_vm5 = vmand %vm81_vm2, %vm82_vm3  ;;  %v191_v42 = vld [vmem:[#allocation7 + $0x78] sm:$0xff]  ;;  %v190_v43 = vld [vmem:[#allocation7 + $0x70] sm:$0xff] }
  0x15   :  { %208 = vmatpush.msra.mxu1 %v191_v42  ;;  %v188_v45 = vld [vmem:[#allocation7 + $0x60] sm:$0xff]  ;;  %v187_v46 = vld [vmem:[#allocation7 + $0x58] sm:$0xff]  ;;  %v186_v47 = vld [vmem:[#allocation7 + $0x50] sm:$0xff] }
  0x16   :  { %119 = vmatpush.msra.mxu0 %v96_v4  ;;  %v185_v48 = vld [vmem:[#allocation7 + $0x48] sm:$0xff]  ;;  %v184_v51 = vld [vmem:[#allocation7 + $0x40] sm:$0xff]  ;;  %v173_v52 = vld [vmem:[#allocation5 + $0x8] sm:$0xff] }
  0x17   :  { %209 = vmatpush.msra.mxu1 %v190_v43  ;;  %v481_v56 = vld [vmem:[%s834_s4 + $0x1] ss:$0 sm:$0xff]  ;;  %v280_v21 = vld [vmem:[#allocation7 + $0xa0] sm:$0xff]  ;;  %v379_v27 = vld [vmem:[%s835_s5 + $0x18] sm:$0xff] }
  0x18   :  { %120 = vmatpush.msra.mxu0 %v95_v5  ;;  %v282_v19 = vld [vmem:[#allocation7 + $0xb0] sm:$0xff]  ;;  %398 = vmatpush.msra.mxu3 %v379_v27 }
  0x19   :  { %210 = vmatpush.msra.mxu1 %v189_v44 }
  0x1a   :  { %121 = vmatpush.msra.mxu0 %v94_v6 }
  0x1b   :  { %211 = vmatpush.msra.mxu1 %v188_v45 }
  0x1c   :  { %122 = vmatpush.msra.mxu0 %v93_v7 }
  0x1d   :  { %212 = vmatpush.msra.mxu1 %v187_v46 }
  0x1e   :  { %123 = vmatpush.msra.mxu0 %v92_v8 }
  0x1f   :  { %213 = vmatpush.msra.mxu1 %v186_v47 }
  0x21   :  { %214 = vmatpush.msra.mxu1 %v185_v48 }
  0x23   :  { %215 = vmatpush.msra.mxu1 %v184_v51 }
  0x82   :  { %v88_v11 = vpop.permute.xlu0 %87 }
  0x83   :  { %v91_v12 = vsel %vm90_vm0, %v78_v10, %v88_v11 }
  0x84   :  { %460 = vmatmul.msk.f32.vlgmr.msra.gmra.mxu0 %vm104_vm1, %v91_v12  ;;  %v263_v12 = vld [vmem:[#allocation2 + $0x10] sm:$0xff] }
  0x85   :  { %v151_v37 = vpop.permute.xlu1 %150 }
 0x101   :  { %v125_v14 = vpop.f32.mrf.mxu0 }
 0x102   :  { %v126_v15 = vadd.f32 %v480_v13, %v125_v14 }
 0x104   :  { %v461_v16 = vmul.f32 -1.442695, %v126_v15 }
 0x106   :  { %484 = vpow2.f32 %v461_v16 }
 0x10c   :  { %v485_v17 = vpop.eup %484 }
 0x10d   :  { %v132_v18 = vadd.f32 1.0, %v485_v17 }
 0x10f   :  { %486 = vrcp.f32 %v132_v18  ;;  %v144_v24 = vand.u32 2147483648, %v132_v18  ;;  %v142_v26 = vand.u32 2147483647, %v132_v18  ;;  %vm138_vm6 = vweird.f32 %v132_v18 }
 0x110   :  { %488 = vtanh.f32 %v126_v15 }
 0x111   :  { %v145_v29 = vor.u32 1.1754944e-38, %v144_v24  ;;  %vm143_vm8 = vcmp.eq.f32.partialorder %v142_v26, 8.507059e+37  ;;  %v277_v24 = vld [vmem:[#allocation7 + $0x88] sm:$0xff] }
 0x115   :  { %v487_v20 = vpop.eup %486 }
 0x116   :  { %v134_v22 = vmul.f32 %v487_v20, %v132_v18  ;;  %vm139_vm4 = vweird.f32 %v487_v20  ;;  %v489_v31 = vpop.eup %488  ;;  %v283_v18 = vld [vmem:[#allocation7 + $0xb8] sm:$0xff] }
 0x117   :  { %vm140_vm7 = vmor %vm138_vm6, %vm139_vm4  ;;  %300 = vmatpush.msra.mxu2 %v283_v18 }
 0x118   :  { %v135_v23 = vsub.f32 1.0, %v134_v22  ;;  %v279_v22 = vld [vmem:[#allocation7 + $0x98] sm:$0xff] }
 0x119   :  { %301 = vmatpush.msra.mxu2 %v282_v19 }
 0x11a   :  { %v136_v25 = vmul.f32 %v487_v20, %v135_v23  ;;  %v278_v23 = vld [vmem:[#allocation7 + $0x90] sm:$0xff] }
 0x11c   :  { %v137_v28 = vadd.f32 %v487_v20, %v136_v25 }
 0x11e   :  { %v141_v30 = vsel %vm140_vm7, %v487_v20, %v137_v28  ;;  %v281_v20 = vld [vmem:[#allocation7 + $0xa8] sm:$0xff]  ;;  %v276_v28 = vld [vmem:[#allocation7 + $0x80] sm:$0xff] }
 0x11f   :  { %v146_v32 = vsel %vm143_vm8, %v145_v29, %v141_v30  ;;  %302 = vmatpush.msra.mxu2 %v281_v20  ;;  %v265_v29 = vld [vmem:[#allocation5 + $0x10] sm:$0xff] }
 0x120   :  { %v148_v33 = vsel %vm749_vm5, %v489_v31, %v146_v32 }
 0x121   :  { %155 = vrot.lane.b32.xlu0 %v148_v33, %s666_s0  ;;  %v153_v38 = vmul.f32 %v151_v37, %v148_v33  ;;  %303 = vmatpush.msra.mxu2 %v280_v21 }
 0x123   :  { %304 = vmatpush.msra.mxu2 %v279_v22 }
 0x125   :  { %305 = vmatpush.msra.mxu2 %v278_v23 }
 0x127   :  { %306 = vmatpush.msra.mxu2 %v277_v24 }
 0x129   :  { %179 = vrot.lane.b32.xlu0 %v171_v36, %s665_s3  ;;  %307 = vmatpush.msra.mxu2 %v276_v28 }
 0x193   :  { %v156_v34 = vpop.permute.xlu0 %155 }
 0x194   :  { %v158_v35 = vmul.f32 %v156_v34, %v148_v33 }
 0x196   :  { %160 = vrot.lane.b32.xlu1 %v158_v35, %s665_s3 }
 0x19b   :  { %v180_v53 = vpop.permute.xlu0 %179 }
 0x208   :  { %v161_v39 = vpop.permute.xlu1 %160 }
 0x209   :  { %v758_v40 = vadd.f32 %v161_v39, %v153_v38 }
 0x20b   :  { %490 = vtanh.f32 %v758_v40 }
 0x211   :  { %v491_v41 = vpop.eup %490 }
 0x212   :  { %166 = vrot.lane.b32.xlu2 %v491_v41, %s666_s0 }
 0x26c   :  { %v167_v49 = vpop.permute.xlu2 %166 }
 0x26d   :  { %v169_v50 = vmul.f32 %v167_v49, %v148_v33  ;;  %v482_v33 = vld [vmem:[%s834_s4 + $0x2] ss:$0 sm:$0xff]  ;;  %s667_s4 = smov 96  }
 0x26f   :  { %175 = vrot.lane.b32.xlu2 %v169_v50, %s665_s3 }
 0x277   :  { %242 = vrot.lane.b32.xlu2 %v173_v52, %s665_s3 }
 0x2c9   :  { %v176_v54 = vpop.permute.xlu2 %175 }
 0x2ca   :  { %358 = vst.msk [vmem:[#allocation9] sm:$0xff] %vm90_vm0, %v176_v54  ;;  %v182_v55 = vsel %vm90_vm0, %v176_v54, %v180_v53 }
 0x2cb   :  { %463 = vmatmul.msk.f32.vlgmr.msra.gmra.mxu1 %vm104_vm1, %v182_v55 }
 0x2d1   :  { %v243_v13 = vpop.permute.xlu2 %242 }
 0x348   :  { %v217_v57 = vpop.f32.mrf.mxu1 }
 0x349   :  { %v218_v58 = vadd.f32 %v481_v56, %v217_v57 }
 0x34b   :  { %v464_v59 = vmul.f32 -1.442695, %v218_v58 }
 0x34d   :  { %492 = vpow2.f32 %v464_v59 }
 0x353   :  { %v493_v60 = vpop.eup %492 }
 0x354   :  { %v224_v61 = vadd.f32 1.0, %v493_v60  ;;  %v377_v60 = vld [vmem:[%s835_s5 + $0x8] sm:$0xff] }
 0x356   :  { %494 = vrcp.f32 %v224_v61  ;;  %v236_v1 = vand.u32 2147483648, %v224_v61  ;;  %v234_v3 = vand.u32 2147483647, %v224_v61  ;;  %vm230_vm10 = vweird.f32 %v224_v61 }
 0x357   :  { %496 = vtanh.f32 %v218_v58 }
 0x358   :  { %v237_v5 = vor.u32 1.1754944e-38, %v236_v1  ;;  %vm235_vm12 = vcmp.eq.f32.partialorder %v234_v3, 8.507059e+37  ;;  %v483_v3 = vld [vmem:[%s836_s6] ss:$0 sm:$0xff] }
 0x35c   :  { %v495_v62 = vpop.eup %494 }
 0x35d   :  { %v226_v63 = vmul.f32 %v495_v62, %v224_v61  ;;  %vm231_vm9 = vweird.f32 %v495_v62  ;;  %v497_v7 = vpop.eup %496  ;;  %v376_v61 = vld [vmem:[%s835_s5] sm:$0xff] }
 0x35e   :  { %vm232_vm11 = vmor %vm230_vm10, %vm231_vm9 }
 0x35f   :  { %v227_v0 = vsub.f32 1.0, %v226_v63 }
 0x361   :  { %v228_v2 = vmul.f32 %v495_v62, %v227_v0 }
 0x363   :  { %v229_v4 = vadd.f32 %v495_v62, %v228_v2 }
 0x365   :  { %v233_v6 = vsel %vm232_vm11, %v495_v62, %v229_v4 }
 0x366   :  { %v238_v8 = vsel %vm235_vm12, %v237_v5, %v233_v6 }
 0x367   :  { %v240_v9 = vsel %vm749_vm5, %v497_v7, %v238_v8 }
 0x368   :  { %247 = vrot.lane.b32.xlu1 %v240_v9, %s666_s0  ;;  %v245_v14 = vmul.f32 %v243_v13, %v240_v9 }
 0x3da   :  { %v248_v10 = vpop.permute.xlu1 %247 }
 0x3db   :  { %v250_v11 = vmul.f32 %v248_v10, %v240_v9 }
 0x3dd   :  { %252 = vrot.lane.b32.xlu0 %v250_v11, %s665_s3 }
 0x3e5   :  { %271 = vrot.lane.b32.xlu0 %v263_v12, %s665_s3 }
 0x44f   :  { %v253_v15 = vpop.permute.xlu0 %252 }
 0x450   :  { %v775_v16 = vadd.f32 %v253_v15, %v245_v14 }
 0x452   :  { %498 = vtanh.f32 %v775_v16 }
 0x457   :  { %v272_v30 = vpop.permute.xlu0 %271 }
 0x458   :  { %v499_v17 = vpop.eup %498 }
 0x459   :  { %258 = vrot.lane.b32.xlu1 %v499_v17, %s666_s0 }
 0x4cb   :  { %v259_v25 = vpop.permute.xlu1 %258 }
 0x4cc   :  { %v261_v26 = vmul.f32 %v259_v25, %v240_v9 }
 0x4ce   :  { %267 = vrot.lane.b32.xlu2 %v261_v26, %s665_s3 }
 0x4d6   :  { %334 = vrot.lane.b32.xlu2 %v265_v29, %s665_s3 }
 0x528   :  { %v268_v31 = vpop.permute.xlu2 %267 }
 0x529   :  { %359 = vst.msk [vmem:[#allocation9 + $0x8] sm:$0xff] %vm90_vm0, %v268_v31  ;;  %v274_v32 = vsel %vm90_vm0, %v268_v31, %v272_v30 }
 0x52a   :  { %466 = vmatmul.msk.f32.vlgmr.msra.gmra.mxu2 %vm104_vm1, %v274_v32 }
 0x530   :  { %v335_v54 = vpop.permute.xlu2 %334 }
 0x5ad   :  { %v309_v34 = vpop.f32.mrf.mxu2 }
 0x5ae   :  { %v310_v35 = vadd.f32 %v482_v33, %v309_v34 }
 0x5b0   :  { %v467_v36 = vmul.f32 -1.442695, %v310_v35 }
 0x5b2   :  { %500 = vpow2.f32 %v467_v36 }
 0x5b8   :  { %v501_v37 = vpop.eup %500 }
 0x5b9   :  { %v316_v38 = vadd.f32 1.0, %v501_v37 }
 0x5bb   :  { %502 = vrcp.f32 %v316_v38  ;;  %v328_v43 = vand.u32 2147483648, %v316_v38  ;;  %v326_v45 = vand.u32 2147483647, %v316_v38  ;;  %vm322_vm14 = vweird.f32 %v316_v38 }
 0x5bc   :  { %504 = vtanh.f32 %v310_v35 }
 0x5bd   :  { %v329_v47 = vor.u32 1.1754944e-38, %v328_v43  ;;  %vm327_vm1 = vcmp.eq.f32.partialorder %v326_v45, 8.507059e+37 }
 0x5c1   :  { %v503_v39 = vpop.eup %502 }
 0x5c2   :  { %v318_v41 = vmul.f32 %v503_v39, %v316_v38  ;;  %vm323_vm13 = vweird.f32 %v503_v39  ;;  %v505_v49 = vpop.eup %504 }
 0x5c3   :  { %vm324_vm15 = vmor %vm322_vm14, %vm323_vm13 }
 0x5c4   :  { %v319_v42 = vsub.f32 1.0, %v318_v41 }
 0x5c6   :  { %v320_v44 = vmul.f32 %v503_v39, %v319_v42 }
 0x5c8   :  { %v321_v46 = vadd.f32 %v503_v39, %v320_v44 }
 0x5ca   :  { %v325_v48 = vsel %vm324_vm15, %v503_v39, %v321_v46 }
 0x5cb   :  { %v330_v50 = vsel %vm327_vm1, %v329_v47, %v325_v48 }
 0x5cc   :  { %v332_v51 = vsel %vm749_vm5, %v505_v49, %v330_v50 }
 0x5cd   :  { %339 = vrot.lane.b32.xlu1 %v332_v51, %s666_s0  ;;  %v337_v55 = vmul.f32 %v335_v54, %v332_v51 }
 0x63f   :  { %v340_v52 = vpop.permute.xlu1 %339 }
 0x640   :  { %v342_v53 = vmul.f32 %v340_v52, %v332_v51 }
 0x642   :  { %344 = vrot.lane.b32.xlu0 %v342_v53, %s665_s3 }
 0x64a   :  { %364 = vrot.lane.b32.xlu0 %v758_v40, %s667_s4  ;;  %v378_v40 = vld [vmem:[%s835_s5 + $0x10] sm:$0xff]  ;;  %s424_s5 = sshll.u32 %s838_s8, 4  ;;  %s425_s5 = int_to_ptr.hbm [resolvable:$true] %s424_s5 }
 0x64b   :  { %399 = vmatpush.msra.mxu3 %v378_v40 }
 0x64d   :  { %400 = vmatpush.msra.mxu3 %v377_v60 }
 0x64f   :  { %401 = vmatpush.msra.mxu3 %v376_v61 }
 0x6b4   :  { %v345_v56 = vpop.permute.xlu0 %344 }
 0x6b5   :  { %v347_v57 = vadd.f32 %v345_v56, %v337_v55 }
 0x6b7   :  { %506 = vtanh.f32 %v347_v57 }
 0x6bc   :  { %v365_v58 = vpop.permute.xlu0 %364 }
 0x6bd   :  { %v507_v59 = vpop.eup %506  ;;  %373 = vst.msk [vmem:[#allocation11] sm:$0xff] %vm90_vm0, %v365_v58 }
 0x6be   :  { %350 = vrot.lane.b32.xlu1 %v507_v59, %s666_s0  ;;  %s670_s0 = smov [#allocation8]  }
 0x6bf   :  { %s412_s28 = sshll.u32 %s670_s0, 4  ;;  %s413_s28 = int_to_ptr.vmem [resolvable:$true] %s412_s28 }
 0x6c6   :  { %366 = vrot.lane.b32.xlu1 %v775_v16, %s667_s4 }
 0x730   :  { %v351_v62 = vpop.permute.xlu1 %350 }
 0x731   :  { %v353_v63 = vmul.f32 %v351_v62, %v332_v51 }
 0x733   :  { %355 = vrot.lane.b32.xlu2 %v353_v63, %s665_s3  ;;  %s435_s3 = sshll.u32 %s669_s23, 4  ;;  %s436_s3 = int_to_ptr.vmem [resolvable:$true] %s435_s3 }
 0x738   :  { %v367_v0 = vpop.permute.xlu1 %366 }
 0x739   :  { %374 = vst.msk [vmem:[#allocation11 + $0x8] sm:$0xff] %vm90_vm0, %v367_v0 }
 0x73b   :  { %368 = vrot.lane.b32.xlu2 %v347_v57, %s667_s4 }
 0x78d   :  { %v356_v1 = vpop.permute.xlu2 %355 }
 0x78e   :  { %360 = vst.msk [vmem:[#allocation9 + $0x10] sm:$0xff] %vm90_vm0, %v356_v1  ;;  %468 = vmatmul.msk.f32.vlgmr.msra.gmra.mxu3 %vm90_vm0, %v356_v1 }
 0x78f   :  { %430 = dma.vmem_to_hbm [thread:$0]  %s423_s22, 384, %s425_s5, [#allocation10], %s661_s17, %s661_s17, %s662_s18  }
 0x795   :  { %v369_v2 = vpop.permute.xlu2 %368 }
 0x796   :  { %375 = vst.msk [vmem:[#allocation11 + $0x10] sm:$0xff] %vm90_vm0, %v369_v2 }
 0x797   :  { %443 = dma.vmem_to_hbm [thread:$0]  %s436_s3, 384, %s438_s26, [#allocation10], %s661_s17, %s661_s17, %s662_s18  }
 0x811   :  { %v403_v4 = vpop.f32.mrf.mxu3 }
 0x812   :  { %v404_v5 = vadd.f32 %v483_v3, %v403_v4 }
 0x814   :  { %406 = vst [vmem:[#allocation8] sm:$0xff] %v404_v5 }
 0x815   :  { %417 = dma.vmem_to_hbm [thread:$0]  %s413_s28, 128, %s415_s10, [#allocation4]  }
 0x816   :  { %656 = dma.done.wait [#allocation4], 128  }
 0x817   :  { %657 = vsyncadd [#allocation4], 4294967168 }
 0x818   :  { %658 = dma.done.wait [#allocation10], 768  }
 0x819   :  { %659 = vsyncadd [#allocation10], 4294966528 }
 0x81a   :  { %456 = vsyncpa [#allocation3], 1 }
 0x81b   :  { %457 = vsyncpa [#allocation6], 1 }
 0x81c   :  { %458 = vsyncpa [#allocation4], 1 }
 0x81d   :  { %459 = vsyncpa [#allocation10], 1 }

</bundles_post_ra>
